<compile_context>
chip_gen: v5e
topology: v5e:2x2
jax: 0.10.0
libtpu: 0.0.40
codegen_flags: <defaults>
</compile_context>

<pallas_src>
import functools

import jax
import jax.numpy as jnp
from jax import lax
from jax.experimental import pallas as pl
from jax.experimental.pallas import tpu as pltpu


def actor_kernel(x_ref, w1_ref, b1_ref, w2_ref, b2_ref,
                 w3_ref, b3_ref, w4_ref, b4_ref, o_ref, *, bf16_tail):
    # If the upstream producer already emits bf16 activations this cast is a
    # no-op; otherwise it happens on the VMEM tile (not as a separate XLA op).
    x = x_ref[...].astype(jnp.bfloat16)

    def hidden_layer(h_in, w_ref, b_ref):
        acc = jnp.dot(h_in, w_ref[...], preferred_element_type=jnp.float32)
        if bf16_tail:
            # v6e/v7x: bf16 VALU -> half the vregs / VALU slot pressure.
            return jnp.maximum(acc.astype(jnp.bfloat16)
                               + b_ref[...].astype(jnp.bfloat16), 0.0)
        # v5e and older: no bf16 VALU; keep elementwise math in f32 and cast
        # once for the next MXU operand.
        return jnp.maximum(acc + b_ref[...], 0.0).astype(jnp.bfloat16)

    h = hidden_layer(x, w1_ref, b1_ref)
    h = hidden_layer(h, w2_ref, b2_ref)
    h = hidden_layer(h, w3_ref, b3_ref)

    # Final layer computed transposed: logits_t[a, m] = sum_k w4[a, k] * h[m, k]
    # -> (nA, tb) with batch on the lane axis (lane-dense).
    logits_t = lax.dot_general(
        w4_ref[...], h, dimension_numbers=(((1,), (1,)), ((), ())),
        preferred_element_type=jnp.float32)
    logits_t = logits_t + b4_ref[...]          # (nA, 1) broadcast along lanes

    # Numerically stable softmax over the action (sublane) axis.
    m = jnp.max(logits_t, axis=0, keepdims=True)
    e = jnp.exp(logits_t - m)
    denom = jnp.sum(e, axis=0, keepdims=True)
    # EUP vrcp (idle slot) + one Newton refinement keeps column sums ~1.
    r = pl.reciprocal(denom, approx=True)
    r = r * (2.0 - denom * r)
    o_ref[...] = (e * r).astype(o_ref.dtype)   # unmasked (nA, tb) store


def _round_up(x, m):
    return -(-x // m) * m


def _pick_batch_tile(B, max_tb=2048):
    """Batch tile for the lane-dense (transposed-output) layout.

    The output block is (nA, tb) with tb on the lane axis, so tb must be a
    multiple of 128 or the whole batch.  Tiles are clamped (not required to
    divide B; Pallas clips the ragged last block) and for B > 128 we keep at
    least two grid steps so the batch can be sharded across both v7x
    TensorCores (harmless on single-TC v5e/v6e).
    """
    if B <= 128:
        return B                                 # full-extent block, 1 step
    tb = min(max_tb, _round_up(B, 128) // 2)     # guarantees >= 2 grid steps
    return max(128, (tb // 128) * 128)


def _use_bf16_tail():
    kind = jax.devices()[0].device_kind.lower()
    # bf16 elementwise only where the VPU has native bf16 (v6e / v7x and newer).
    return not any(v in kind for v in ("v2", "v3", "v4", "v5"))


@functools.partial(jax.jit, static_argnames=("block_b",))
def actor_forward(x, params, block_b=None):
    """x: (B, nS) f32 or bf16; params from init_actor_params. Returns (B, nA) f32."""
    B, nS = x.shape
    nA = params["w4"].shape[0]
    tb = _pick_batch_tile(B) if block_b is None else block_b
    assert tb == B or tb % 128 == 0, "batch tile must be a multiple of 128 or B"

    bf16_tail = _use_bf16_tail()

    args = (x,
            params["w1"], params["b1"],
            params["w2"], params["b2"],
            params["w3"], params["b3"],
            params["w4"], params["b4"])

    # x is tiled over the batch; weights/biases map to block 0 every grid step
    # so they stay resident in VMEM for the whole kernel.
    resident = lambda a: pl.BlockSpec(a.shape, lambda i: (0,) * a.ndim)
    in_specs = ([pl.BlockSpec((tb, nS), lambda i: (i, 0))]
                + [resident(a) for a in args[1:]])
    out_specs = pl.BlockSpec((nA, tb), lambda i: (0, i))   # lane-dense output

    out_t = pl.pallas_call(
        functools.partial(actor_kernel, bf16_tail=bf16_tail),
        out_shape=jax.ShapeDtypeStruct((nA, B), jnp.float32),
        grid=(pl.cdiv(B, tb),),
        in_specs=in_specs,
        out_specs=out_specs,
        compiler_params=pltpu.CompilerParams(
            dimension_semantics=("parallel",),      # batch sharding on v7x
            vmem_limit_bytes=32 * 1024 * 1024),     # explicit, portable limit
    )(*args)
    # Tiny (nA, B) -> (B, nA) fix-up outside the kernel to preserve the
    # module's (batch, actions) output contract.
    return out_t.T


def init_actor_params(key, nS, nA):
    """Synthetic init matching the Actor's nn.Linear shapes.

    w1..w3 are stored (in, out) bf16 with (1, out) f32 biases; w4 keeps the
    PyTorch (out, in) layout (bf16) with a (out, 1) f32 bias so the last layer,
    softmax and store run in the transposed, lane-dense layout.
    """
    kh = nS * 2
    keys = jax.random.split(key, 8)

    def lin(kw, kb, fan_in, fan_out, transposed=False):
        bound = 1.0 / jnp.sqrt(fan_in)
        w_shape = (fan_out, fan_in) if transposed else (fan_in, fan_out)
        b_shape = (fan_out, 1) if transposed else (1, fan_out)
        w = jax.random.uniform(kw, w_shape, jnp.float32, -bound, bound)
        b = jax.random.uniform(kb, b_shape, jnp.float32, -bound, bound)
        return w.astype(jnp.bfloat16), b

    w1, b1 = lin(keys[0], keys[1], nS, kh)
    w2, b2 = lin(keys[2], keys[3], kh, kh)
    w3, b3 = lin(keys[4], keys[5], kh, kh)
    w4, b4 = lin(keys[6], keys[7], kh, nA, transposed=True)
    return dict(w1=w1, b1=b1, w2=w2, b2=b2, w3=w3, b3=b3, w4=w4, b4=b4)


def actor_ref(x, params, bf16_tail):
    """Pure-JAX reference mirroring the kernel's dtype choices."""
    # TODO(synk): weights are bf16 (MXU-native); an exact-f32 PyTorch match
    # would require f32 weights end to end.
    h = x.astype(jnp.bfloat16)
    for i in (1, 2, 3):
        acc = jnp.dot(h, params[f"w{i}"], preferred_element_type=jnp.float32)
        b = params[f"b{i}"]
        if bf16_tail:
            h = jnp.maximum(acc.astype(jnp.bfloat16) + b.astype(jnp.bfloat16), 0.0)
        else:
            h = jnp.maximum(acc + b, 0.0).astype(jnp.bfloat16)
    logits = jnp.dot(h, params["w4"].T, preferred_element_type=jnp.float32)
    logits = logits + params["b4"].reshape(1, -1)
    return jax.nn.softmax(logits, axis=1)


if __name__ == "__main__":
    # B deliberately NOT a multiple of the 128-row tile: exercises the 2-step
    # grid and Pallas ragged-block clipping on both input reads and output writes.
    nS, nA, B = 32, 8, 200
    key = jax.random.PRNGKey(0)
    k_x, k_p = jax.random.split(key)
    x = jax.random.normal(k_x, (B, nS), dtype=jnp.float32)
    params = init_actor_params(k_p, nS, nA)

    out = actor_forward(x, params)          # auto tile: 128 rows, 2 grid steps
    out = jax.block_until_ready(out)

    ref = actor_ref(x, params, _use_bf16_tail())

    assert out.shape == (B, nA)
    # Newton-refined EUP reciprocal keeps softmax row sums within ~1e-5..1e-4.
    assert jnp.allclose(jnp.sum(out, axis=1), 1.0, atol=1e-4)
    assert jnp.allclose(out, ref, atol=2e-3, rtol=2e-3)
    print("KERNEL_OK")
</pallas_src>

<mosaic_0001>
module attributes {stable_mosaic.version = 11 : i64} {
  func.func @actor_kernel(%arg0: i32, %arg1: memref<128x32xf32, #tpu.memory_space<vmem>>, %arg2: memref<32x64xbf16, #tpu.memory_space<vmem>>, %arg3: memref<1x64xf32, #tpu.memory_space<vmem>>, %arg4: memref<64x64xbf16, #tpu.memory_space<vmem>>, %arg5: memref<1x64xf32, #tpu.memory_space<vmem>>, %arg6: memref<64x64xbf16, #tpu.memory_space<vmem>>, %arg7: memref<1x64xf32, #tpu.memory_space<vmem>>, %arg8: memref<8x64xbf16, #tpu.memory_space<vmem>>, %arg9: memref<8x1xf32, #tpu.memory_space<vmem>>, %arg10: memref<8x128xf32, #tpu.memory_space<vmem>>) attributes {dimension_semantics = [#tpu.dimension_semantics<parallel>], iteration_bounds = array<i64: 2>, scalar_prefetch = 0 : i64, scratch_operands = 0 : i64, tpu.core_type = #tpu.core_type<tc>, window_params = [{transform_indices = @transform_0, window_bounds = array<i64: 128, 32>}, {pipeline_mode = #tpu.pipeline_mode<synchronous>, transform_indices = @transform_1, window_bounds = array<i64: 32, 64>}, {pipeline_mode = #tpu.pipeline_mode<synchronous>, transform_indices = @transform_2, window_bounds = array<i64: 1, 64>}, {pipeline_mode = #tpu.pipeline_mode<synchronous>, transform_indices = @transform_3, window_bounds = array<i64: 64, 64>}, {pipeline_mode = #tpu.pipeline_mode<synchronous>, transform_indices = @transform_4, window_bounds = array<i64: 1, 64>}, {pipeline_mode = #tpu.pipeline_mode<synchronous>, transform_indices = @transform_5, window_bounds = array<i64: 64, 64>}, {pipeline_mode = #tpu.pipeline_mode<synchronous>, transform_indices = @transform_6, window_bounds = array<i64: 1, 64>}, {pipeline_mode = #tpu.pipeline_mode<synchronous>, transform_indices = @transform_7, window_bounds = array<i64: 8, 64>}, {pipeline_mode = #tpu.pipeline_mode<synchronous>, transform_indices = @transform_8, window_bounds = array<i64: 8, 1>}, {transform_indices = @transform_9, window_bounds = array<i64: 8, 128>}]} {
    %c0 = arith.constant 0 : index
    %c0_0 = arith.constant 0 : index
    %0 = vector.load %arg1[%c0, %c0_0] : memref<128x32xf32, #tpu.memory_space<vmem>>, vector<128x32xf32>
    %1 = arith.truncf %0 : vector<128x32xf32> to vector<128x32xbf16>
    %c0_1 = arith.constant 0 : index
    %c0_2 = arith.constant 0 : index
    %2 = vector.load %arg2[%c0_1, %c0_2] : memref<32x64xbf16, #tpu.memory_space<vmem>>, vector<32x64xbf16>
    %cst = arith.constant dense<0.000000e+00> : vector<128x64xf32>
    %3 = tpu.matmul %1, %2, %cst {dimension_numbers = #tpu.dot_dimension_numbers<[1], [0], [0], [1], [0, 0, 1, 1], [], []>} : vector<128x32xbf16>, vector<32x64xbf16>, vector<128x64xf32> -> vector<128x64xf32>
    %4 = arith.truncf %3 : vector<128x64xf32> to vector<128x64xbf16>
    %c0_3 = arith.constant 0 : index
    %c0_4 = arith.constant 0 : index
    %5 = vector.load %arg3[%c0_3, %c0_4] : memref<1x64xf32, #tpu.memory_space<vmem>>, vector<1x64xf32>
    %6 = arith.truncf %5 : vector<1x64xf32> to vector<1x64xbf16>
    %7 = vector.broadcast %6 : vector<1x64xbf16> to vector<128x64xbf16>
    %8 = arith.addf %4, %7 : vector<128x64xbf16>
    %cst_5 = arith.constant 0.000000e+00 : bf16
    %9 = vector.broadcast %cst_5 : bf16 to vector<128x64xbf16>
    %10 = arith.maximumf %8, %9 : vector<128x64xbf16>
    %c0_6 = arith.constant 0 : index
    %c0_7 = arith.constant 0 : index
    %11 = vector.load %arg4[%c0_6, %c0_7] : memref<64x64xbf16, #tpu.memory_space<vmem>>, vector<64x64xbf16>
    %cst_8 = arith.constant dense<0.000000e+00> : vector<128x64xf32>
    %12 = tpu.matmul %10, %11, %cst_8 {dimension_numbers = #tpu.dot_dimension_numbers<[1], [0], [0], [1], [0, 0, 1, 1], [], []>} : vector<128x64xbf16>, vector<64x64xbf16>, vector<128x64xf32> -> vector<128x64xf32>
    %13 = arith.truncf %12 : vector<128x64xf32> to vector<128x64xbf16>
    %c0_9 = arith.constant 0 : index
    %c0_10 = arith.constant 0 : index
    %14 = vector.load %arg5[%c0_9, %c0_10] : memref<1x64xf32, #tpu.memory_space<vmem>>, vector<1x64xf32>
    %15 = arith.truncf %14 : vector<1x64xf32> to vector<1x64xbf16>
    %16 = vector.broadcast %15 : vector<1x64xbf16> to vector<128x64xbf16>
    %17 = arith.addf %13, %16 : vector<128x64xbf16>
    %cst_11 = arith.constant 0.000000e+00 : bf16
    %18 = vector.broadcast %cst_11 : bf16 to vector<128x64xbf16>
    %19 = arith.maximumf %17, %18 : vector<128x64xbf16>
    %c0_12 = arith.constant 0 : index
    %c0_13 = arith.constant 0 : index
    %20 = vector.load %arg6[%c0_12, %c0_13] : memref<64x64xbf16, #tpu.memory_space<vmem>>, vector<64x64xbf16>
    %cst_14 = arith.constant dense<0.000000e+00> : vector<128x64xf32>
    %21 = tpu.matmul %19, %20, %cst_14 {dimension_numbers = #tpu.dot_dimension_numbers<[1], [0], [0], [1], [0, 0, 1, 1], [], []>} : vector<128x64xbf16>, vector<64x64xbf16>, vector<128x64xf32> -> vector<128x64xf32>
    %22 = arith.truncf %21 : vector<128x64xf32> to vector<128x64xbf16>
    %c0_15 = arith.constant 0 : index
    %c0_16 = arith.constant 0 : index
    %23 = vector.load %arg7[%c0_15, %c0_16] : memref<1x64xf32, #tpu.memory_space<vmem>>, vector<1x64xf32>
    %24 = arith.truncf %23 : vector<1x64xf32> to vector<1x64xbf16>
    %25 = vector.broadcast %24 : vector<1x64xbf16> to vector<128x64xbf16>
    %26 = arith.addf %22, %25 : vector<128x64xbf16>
    %cst_17 = arith.constant 0.000000e+00 : bf16
    %27 = vector.broadcast %cst_17 : bf16 to vector<128x64xbf16>
    %28 = arith.maximumf %26, %27 : vector<128x64xbf16>
    %c0_18 = arith.constant 0 : index
    %c0_19 = arith.constant 0 : index
    %29 = vector.load %arg8[%c0_18, %c0_19] : memref<8x64xbf16, #tpu.memory_space<vmem>>, vector<8x64xbf16>
    %cst_20 = arith.constant dense<0.000000e+00> : vector<8x128xf32>
    %30 = tpu.matmul %29, %28, %cst_20 {dimension_numbers = #tpu.dot_dimension_numbers<[1], [1], [0], [0], [0, 0, 1, 0], [], []>} : vector<8x64xbf16>, vector<128x64xbf16>, vector<8x128xf32> -> vector<8x128xf32>
    %c0_21 = arith.constant 0 : index
    %c0_22 = arith.constant 0 : index
    %31 = vector.load %arg9[%c0_21, %c0_22] : memref<8x1xf32, #tpu.memory_space<vmem>>, vector<8x1xf32>
    %32 = vector.broadcast %31 : vector<8x1xf32> to vector<8x128xf32>
    %33 = arith.addf %30, %32 : vector<8x128xf32>
    %cst_23 = arith.constant dense<0xFF800000> : vector<128xf32>
    %34 = vector.multi_reduction <maximumf>, %33, %cst_23 [0] : vector<8x128xf32> to vector<128xf32>
    %35 = vector.shape_cast %34 : vector<128xf32> to vector<1x128xf32>
    %36 = vector.broadcast %35 : vector<1x128xf32> to vector<8x128xf32>
    %37 = arith.subf %33, %36 : vector<8x128xf32>
    %38 = math.exp %37 : vector<8x128xf32>
    %cst_24 = arith.constant dense<0.000000e+00> : vector<128xf32>
    %39 = vector.multi_reduction <add>, %38, %cst_24 [0] : vector<8x128xf32> to vector<128xf32>
    %40 = vector.shape_cast %39 : vector<128xf32> to vector<1x128xf32>
    %41 = tpu.reciprocal %40 {approx = true} : vector<1x128xf32> -> vector<1x128xf32>
    %42 = arith.mulf %40, %41 : vector<1x128xf32>
    %cst_25 = arith.constant 2.000000e+00 : f32
    %43 = vector.broadcast %cst_25 : f32 to vector<1x128xf32>
    %44 = arith.subf %43, %42 : vector<1x128xf32>
    %45 = arith.mulf %41, %44 : vector<1x128xf32>
    %46 = vector.broadcast %45 : vector<1x128xf32> to vector<8x128xf32>
    %47 = arith.mulf %38, %46 : vector<8x128xf32>
    %c0_26 = arith.constant 0 : index
    %c0_27 = arith.constant 0 : index
    %48 = vector.load %arg10[%c0_26, %c0_27] : memref<8x128xf32, #tpu.memory_space<vmem>>, vector<8x128xf32>
    tpu.vector_store %arg10[%c0_26, %c0_27], %47 {strides = array<i32>} : memref<8x128xf32, #tpu.memory_space<vmem>>, vector<8x128xf32>,
    return
  }
  func.func @transform_0(%arg0: i32) -> (i32, i32) {
    %c0_i32 = arith.constant 0 : i32
    %c0_i32_0 = arith.constant 0 : i32
    return %arg0, %c0_i32 : i32, i32
  }
  func.func @transform_1(%arg0: i32) -> (i32, i32) {
    %c0_i32 = arith.constant 0 : i32
    %c0_i32_0 = arith.constant 0 : i32
    %c0_i32_1 = arith.constant 0 : i32
    return %c0_i32, %c0_i32_0 : i32, i32
  }
  func.func @transform_2(%arg0: i32) -> (i32, i32) {
    %c0_i32 = arith.constant 0 : i32
    %c0_i32_0 = arith.constant 0 : i32
    %c0_i32_1 = arith.constant 0 : i32
    return %c0_i32, %c0_i32_0 : i32, i32
  }
  func.func @transform_3(%arg0: i32) -> (i32, i32) {
    %c0_i32 = arith.constant 0 : i32
    %c0_i32_0 = arith.constant 0 : i32
    %c0_i32_1 = arith.constant 0 : i32
    return %c0_i32, %c0_i32_0 : i32, i32
  }
  func.func @transform_4(%arg0: i32) -> (i32, i32) {
    %c0_i32 = arith.constant 0 : i32
    %c0_i32_0 = arith.constant 0 : i32
    %c0_i32_1 = arith.constant 0 : i32
    return %c0_i32, %c0_i32_0 : i32, i32
  }
  func.func @transform_5(%arg0: i32) -> (i32, i32) {
    %c0_i32 = arith.constant 0 : i32
    %c0_i32_0 = arith.constant 0 : i32
    %c0_i32_1 = arith.constant 0 : i32
    return %c0_i32, %c0_i32_0 : i32, i32
  }
  func.func @transform_6(%arg0: i32) -> (i32, i32) {
    %c0_i32 = arith.constant 0 : i32
    %c0_i32_0 = arith.constant 0 : i32
    %c0_i32_1 = arith.constant 0 : i32
    return %c0_i32, %c0_i32_0 : i32, i32
  }
  func.func @transform_7(%arg0: i32) -> (i32, i32) {
    %c0_i32 = arith.constant 0 : i32
    %c0_i32_0 = arith.constant 0 : i32
    %c0_i32_1 = arith.constant 0 : i32
    return %c0_i32, %c0_i32_0 : i32, i32
  }
  func.func @transform_8(%arg0: i32) -> (i32, i32) {
    %c0_i32 = arith.constant 0 : i32
    %c0_i32_0 = arith.constant 0 : i32
    %c0_i32_1 = arith.constant 0 : i32
    return %c0_i32, %c0_i32_0 : i32, i32
  }
  func.func @transform_9(%arg0: i32) -> (i32, i32) {
    %c0_i32 = arith.constant 0 : i32
    %c0_i32_0 = arith.constant 0 : i32
    return %c0_i32, %arg0 : i32, i32
  }
}

</mosaic_0001>

<bundles_post_ra>
// kernel: actor_forward.1
= control target key start
LH: loop header
LB: loop body
LE: loop exit
PB: predicated region body
PF: predicated region fallthrough
CT: control target
= control target key end

     0   :  { %14 = vsyncpa [#allocation3], 0  ;;  %s1644_s0 = inlined_call_operand.vmem [shape: f32[200,32], index: 0, kind: input, shape index: {}]   ;;  %s1645_s1 = inlined_call_operand.vmem [shape: bf16[32,64], index: 1, kind: input, shape index: {}]   ;;  %s1646_s2 = inlined_call_operand.vmem [shape: f32[1,64], index: 2, kind: input, shape index: {}]   ;;  %s1647_s3 = inlined_call_operand.vmem [shape: bf16[64,64], index: 3, kind: input, shape index: {}]   ;;  %s1648_s4 = inlined_call_operand.vmem [shape: f32[1,64], index: 4, kind: input, shape index: {}]   ;;  %s1649_s5 = inlined_call_operand.vmem [shape: bf16[64,64], index: 5, kind: input, shape index: {}]   ;;  %s1650_s6 = inlined_call_operand.vmem [shape: f32[1,64], index: 6, kind: input, shape index: {}]   ;;  %s1651_s7 = inlined_call_operand.vmem [shape: bf16[8,64], index: 7, kind: input, shape index: {}]   ;;  %s1652_s8 = inlined_call_operand.vmem [shape: f32[8,1], index: 8, kind: input, shape index: {}]   ;;  %s1653_s9 = inlined_call_operand.hbm [shape: f32[8,200], index: 9, kind: output, shape index: {}]  }
   0x1   :  { %16 = vsyncpa [#allocation3 + $0x1], 0  ;;  %s1401_s30 = smov 0   ;;  %s1403_s10 = smov 0  }
   0x2   :  { %s1405_s11 = smov 0   ;;  %s1407_s12 = smov 0  }
   0x3 LB: > { %s1422_s13 = sadd.s32 4294967295, %s1348_s12   ;;  %s1155_s14 = sadd.s32 4294967294, %s1348_s12   ;;  %s1348_s12 = sphi %s1407_s12, %s1659_s12   ;;  %s1344_s11 = sphi %s1405_s11, %s1658_s11   ;;  %s1340_s10 = sphi %s1403_s10, %s1657_s10   ;;  %s1336_s30 = sphi %s1401_s30, %s1656_s30  }
   0x4   : > { %s1426_s15 = sadd.s32 1, %s1348_s12   ;;  %s223_s16 = sadd.s32 1, %s1344_s11 }
   0x5   : > { %s220_s17 = ssub.s32 %s1348_s12, %s1426_s15  ;;  %p233_p0 = scmp.ne.s32.totalorder %s1344_s11, %s1340_s10 }
   0x6   : > { %p221_p1 = scmp.eq.s32.totalorder %s220_s17, 0  ;;  %p234_p2 = scmp.eq.s32.totalorder %s1422_s13, 1 }
   0x7   : > { %p239_p3 = scmp.ne.s32.totalorder %s1340_s10, %s1336_s30  ;;  %p240_p4 = scmp.eq.s32.totalorder %s1155_s14, 1 }
   0x8   : > { %s1437_s18 = scalar_select %p221_p1, %s1344_s11, %s223_s16  }
   0x9   : > { %p1439_p5 = por %p234_p2, %p233_p0  ;;  %p1443_p6 = por %p240_p4, %p239_p3 }
   0xa   : > { %p1158_p7 = scmp.ge.s32.totalorder %s1348_s12, 1  ;;  %p299_p8 = scmp.lt.s32.totalorder %s1348_s12, 3 }
   0xc   : > { %p300_p9 = pnand %p1158_p7, %p299_p8 }
   0xd   : > { %s1160_s23 = sshll.u32 (!%p300_p9), %s1422_s13, 4  ;;  %s336_s17 = sand.u32 (!%p300_p9), 1, %s1340_s10  }
   0xe   : > { %303 = sbr.rel (%p300_p9) target bundleno = 828 (0x33c), region = 56  ;;  %p344_p10 = scmp.lt.s32.totalorder (!%p300_p9), %s1160_s23, 24 }
   0xf   : > { %s1159_s21 = sshll.u32 (!%p300_p9), %s336_s17, 3  ;;  %s1228_s22 = sshll.u32 (!%p300_p9), %s1422_s13, 3 }
  0x10   : > { %s1091_s25 = scalar_lea.hbm (!%p300_p9), %s1653_s9, %s1228_s22  ;;  %s1306_s22 = scalar_lea.hbm (!%p300_p9), %s1653_s9, 16 }
  0x11   : > { %s1095_s28 = sshll.u32 (!%p300_p9), %s1091_s25, 4  ;;  %s1096_s28 = int_to_ptr.hbm [resolvable:$true] %s1095_s28 }
  0x12   : > { %s1300_s14 = sshra.s32 (!%p300_p9), %s1096_s28, 4  ;;  %s1301_s14 = int_to_ptr.hbm [resolvable:$true] %s1300_s14 }
  0x13   : > { %v1232_v0 = vld [vmem:[%s1645_s1 + $0x8] sm:$0xff]  ;;  %v1231_v1 = vld [vmem:[%s1645_s1] sm:$0xff]  ;;  %s1661_s23 = smov (!%p344_p10, %s1160_s23), 24  ;;  %vm394_vm0 = vcmask 261120   ;;  %v1236_v23 = vld [vmem:[%s1647_s3 + $0x18] sm:$0xff]  ;;  %vm611_vm1 = vcmask 523264   ;;  %p1307_p0 = scmp.lt.s32.totalorder %s1301_s14, %s1653_s9 }
  0x14   : > { %425 = vmatpush.bf16.msra.mxu0 %v1232_v0  ;;  %s1161_s26 = sshll.u32 %s1661_s23, 3  ;;  %640 = vmatpush.bf16.msra.mxu1 %v1236_v23  ;;  %v1235_v24 = vld [vmem:[%s1647_s3 + $0x10] sm:$0xff]  ;;  %v1234_v25 = vld [vmem:[%s1647_s3 + $0x8] sm:$0xff]  ;;  %v1233_v28 = vld [vmem:[%s1647_s3] sm:$0xff]  ;;  %s1302_s13 = scalar_lea.hbm %s1301_s14, 8 }
  0x15   : > { %s1459_s29 = scalar_lea.vmem %s1644_s0, %s1161_s26  ;;  %v484_v30 = vld [vmem:[%s1646_s2] sm:$0x1]  ;;  %s338_s26 = scalar_lea.vmem [#allocation2], %s1159_s21 }
  0x16   : > { %v354_v2 = vld [vmem:[%s1459_s29] sm:$0xff]  ;;  %v355_v3 = vld [vmem:[%s1459_s29 + $0x8] sm:$0xff]  ;;  %v356_v5 = vld [vmem:[%s1459_s29 + $0x10] sm:$0xff]  ;;  %v485_v31 = vpack.c.bf16 %v484_v30, %v484_v30  ;;  %s1093_s27 = sshll.u32 %s338_s26, 4  ;;  %p1303_p11 = scmp.ne.s32.totalorder %s1301_s14, %s1302_s13  ;;  %s1094_s27 = int_to_ptr.vmem [resolvable:$true] %s1093_s27 }
  0x17   : > { %v370_v4 = vpack.c.bf16 %v355_v3, %v354_v2  ;;  %v357_v6 = vld [vmem:[%s1459_s29 + $0x18] sm:$0xff]  ;;  %v358_v8 = vld [vmem:[%s1459_s29 + $0x20] sm:$0xff]  ;;  %v359_v9 = vld [vmem:[%s1459_s29 + $0x28] sm:$0xff]  ;;  %p1308_p1 = scmp.lt.s32.totalorder %s1306_s22, %s1302_s13 }
  0x18   : > { %426 = vmatpush.bf16.msra.mxu0 %v1231_v1  ;;  %v371_v7 = vpack.c.bf16 %v357_v6, %v356_v5  ;;  %v372_v10 = vpack.c.bf16 %v359_v9, %v358_v8  ;;  %v360_v11 = vld [vmem:[%s1459_s29 + $0x30] sm:$0xff]  ;;  %v361_v12 = vld [vmem:[%s1459_s29 + $0x38] sm:$0xff]  ;;  %v362_v14 = vld [vmem:[%s1459_s29 + $0x40] sm:$0xff]  ;;  %641 = vmatpush.bf16.msra.mxu1 %v1235_v24  ;;  %v487_v32 = vpack.i.b16 %v485_v31, %v485_v31  ;;  %p1304_p12 = pnand %p1303_p11, %p1439_p5 }
  0x19   : > { %v373_v13 = vpack.c.bf16 %v361_v12, %v360_v11  ;;  %v363_v15 = vld [vmem:[%s1459_s29 + $0x48] sm:$0xff]  ;;  %v364_v17 = vld [vmem:[%s1459_s29 + $0x50] sm:$0xff]  ;;  %v365_v18 = vld [vmem:[%s1459_s29 + $0x58] sm:$0xff]  ;;  %p1309_p2 = por %p1308_p1, %p1307_p0 }
  0x1a   : > { %v374_v16 = vpack.c.bf16 %v363_v15, %v362_v14  ;;  %v375_v19 = vpack.c.bf16 %v365_v18, %v364_v17  ;;  %v366_v20 = vld [vmem:[%s1459_s29 + $0x60] sm:$0xff]  ;;  %v367_v21 = vld [vmem:[%s1459_s29 + $0x68] sm:$0xff]  ;;  %v368_v26 = vld [vmem:[%s1459_s29 + $0x70] sm:$0xff]  ;;  %v489_v35 = vperm.slane %v487_v32, 0  ;;  %p1305_p13 = pneg %p1304_p12 }
  0x1b   : > { %1170 = vmatmul.msk.bf16.vlgmr.msra.gmra.mxu0 %vm394_vm0, %v370_v4  ;;  %v376_v22 = vpack.c.bf16 %v367_v21, %v366_v20  ;;  %v369_v27 = vld [vmem:[%s1459_s29 + $0x78] sm:$0xff]  ;;  %s1081_s29 = scalar_lea.sflag [#allocation3], %s336_s17 }
  0x1c   : > { %642 = vmatpush.bf16.msra.mxu1 %v1234_v25  ;;  %v377_v29 = vpack.c.bf16 %v369_v27, %v368_v26  ;;  %v1500_v37 = vunpack.c.l.bf16 %v489_v35  ;;  %p1310_p3 = pnand %p1309_p2, %p1305_p13 }
  0x20   : > { %643 = vmatpush.bf16.msra.mxu1 %v1233_v28 }
  0x2b   : > { %1171 = vmatmul.msk.bf16.gmra.mxu0 %vm394_vm0, %v371_v7 }
  0x3b   : > { %1172 = vmatmul.msk.bf16.gmra.mxu0 %vm394_vm0, %v372_v10 }
  0x4b   : > { %1173 = vmatmul.msk.bf16.gmra.mxu0 %vm394_vm0, %v373_v13 }
  0x5b   : > { %1174 = vmatmul.msk.bf16.gmra.mxu0 %vm394_vm0, %v374_v16 }
  0x6b   : > { %1175 = vmatmul.msk.bf16.gmra.mxu0 %vm394_vm0, %v375_v19 }
  0x7b   : > { %1176 = vmatmul.msk.bf16.gmra.mxu0 %vm394_vm0, %v376_v22 }
  0x8b   : > { %1177 = vmatmul.msk.bf16.gmra.mxu0 %vm394_vm0, %v377_v29 }
  0x98   : > { %v428_v33 = vpop.f32.mrf.mxu0 }
  0x99   : > { %v468_v34 = vpack.c.bf16 %v428_v33, %v428_v33 }
  0x9b   : > { %v490_v36 = vunpack.c.l.bf16 %v468_v34 }
  0x9d   : > { %v507_v40 = vadd.f32 %v1500_v37, %v490_v36 }
  0x9f   : > { %v555_v43 = vmax.f32 %v507_v40, 0.0 }
  0xa0   : > { %v430_v38 = vpop.f32.mrf.mxu0 }
  0xa1   : > { %v469_v39 = vpack.c.bf16 %v430_v38, %v430_v38 }
  0xa3   : > { %v491_v41 = vunpack.c.l.bf16 %v469_v39 }
  0xa5   : > { %v508_v42 = vadd.f32 %v1500_v37, %v491_v41 }
  0xa7   : > { %v556_v44 = vmax.f32 %v508_v42, 0.0 }
  0xa8   : > { %v433_v45 = vpop.f32.mrf.mxu0 }
  0xa9   : > { %v571_v46 = vpack.c.bf16 %v556_v44, %v555_v43  ;;  %v470_v47 = vpack.c.bf16 %v433_v45, %v433_v45 }
  0xab   : > { %1194 = vmatmul.msk.bf16.vlgmr.msra.gmra.mxu1 %vm611_vm1, %v571_v46  ;;  %v492_v48 = vunpack.c.l.bf16 %v470_v47 }
  0xad   : > { %v509_v51 = vadd.f32 %v1500_v37, %v492_v48 }
  0xaf   : > { %v557_v54 = vmax.f32 %v509_v51, 0.0 }
  0xb0   : > { %v435_v49 = vpop.f32.mrf.mxu0 }
  0xb1   : > { %v471_v50 = vpack.c.bf16 %v435_v49, %v435_v49 }
  0xb3   : > { %v493_v52 = vunpack.c.l.bf16 %v471_v50  ;;  %v1240_v50 = vld [vmem:[%s1649_s5 + $0x18] sm:$0xff] }
  0xb4   : > { %856 = vmatpush.bf16.msra.mxu2 %v1240_v50 }
  0xb5   : > { %v510_v53 = vadd.f32 %v1500_v37, %v493_v52  ;;  %v1239_v52 = vld [vmem:[%s1649_s5 + $0x10] sm:$0xff] }
  0xb7   : > { %v558_v55 = vmax.f32 %v510_v53, 0.0 }
  0xb8   : > { %v438_v56 = vpop.f32.mrf.mxu0  ;;  %857 = vmatpush.bf16.msra.mxu2 %v1239_v52 }
  0xb9   : > { %v572_v57 = vpack.c.bf16 %v558_v55, %v557_v54  ;;  %v472_v58 = vpack.c.bf16 %v438_v56, %v438_v56  ;;  %v1238_v56 = vld [vmem:[%s1649_s5 + $0x8] sm:$0xff] }
  0xbb   : > { %1195 = vmatmul.msk.bf16.gmra.mxu1 %vm611_vm1, %v572_v57  ;;  %v494_v59 = vunpack.c.l.bf16 %v472_v58 }
  0xbc   : > { %858 = vmatpush.bf16.msra.mxu2 %v1238_v56 }
  0xbd   : > { %v511_v62 = vadd.f32 %v1500_v37, %v494_v59 }
  0xbf   : > { %v559_v1 = vmax.f32 %v511_v62, 0.0 }
  0xc0   : > { %v440_v60 = vpop.f32.mrf.mxu0 }
  0xc1   : > { %v473_v61 = vpack.c.bf16 %v440_v60, %v440_v60  ;;  %v1237_v60 = vld [vmem:[%s1649_s5] sm:$0xff] }
  0xc2   : > { %859 = vmatpush.bf16.msra.mxu2 %v1237_v60 }
  0xc3   : > { %v495_v63 = vunpack.c.l.bf16 %v473_v61 }
  0xc5   : > { %v512_v0 = vadd.f32 %v1500_v37, %v495_v63 }
  0xc7   : > { %v560_v2 = vmax.f32 %v512_v0, 0.0  ;;  %v701_v0 = vld [vmem:[%s1648_s4] sm:$0x1] }
  0xc8   : > { %v443_v3 = vpop.f32.mrf.mxu0 }
  0xc9   : > { %v573_v4 = vpack.c.bf16 %v560_v2, %v559_v1  ;;  %v474_v5 = vpack.c.bf16 %v443_v3, %v443_v3  ;;  %v702_v1 = vpack.c.bf16 %v701_v0, %v701_v0 }
  0xcb   : > { %1196 = vmatmul.msk.bf16.gmra.mxu1 %vm611_vm1, %v573_v4  ;;  %v496_v6 = vunpack.c.l.bf16 %v474_v5  ;;  %v704_v2 = vpack.i.b16 %v702_v1, %v702_v1 }
  0xcd   : > { %v513_v9 = vadd.f32 %v1500_v37, %v496_v6  ;;  %v706_v5 = vperm.slane %v704_v2, 0 }
  0xcf   : > { %v561_v12 = vmax.f32 %v513_v9, 0.0  ;;  %v1541_v6 = vunpack.c.l.bf16 %v706_v5 }
  0xd0   : > { %v445_v7 = vpop.f32.mrf.mxu0 }
  0xd1   : > { %v475_v8 = vpack.c.bf16 %v445_v7, %v445_v7 }
  0xd3   : > { %v497_v10 = vunpack.c.l.bf16 %v475_v8 }
  0xd5   : > { %v514_v11 = vadd.f32 %v1500_v37, %v497_v10 }
  0xd7   : > { %v562_v13 = vmax.f32 %v514_v11, 0.0 }
  0xd8   : > { %v448_v14 = vpop.f32.mrf.mxu0 }
  0xd9   : > { %v574_v15 = vpack.c.bf16 %v562_v13, %v561_v12  ;;  %v476_v16 = vpack.c.bf16 %v448_v14, %v448_v14 }
  0xdb   : > { %1197 = vmatmul.msk.bf16.gmra.mxu1 %vm611_vm1, %v574_v15  ;;  %v498_v17 = vunpack.c.l.bf16 %v476_v16 }
  0xdd   : > { %v515_v20 = vadd.f32 %v1500_v37, %v498_v17 }
  0xdf   : > { %v563_v23 = vmax.f32 %v515_v20, 0.0 }
  0xe0   : > { %v450_v18 = vpop.f32.mrf.mxu0 }
  0xe1   : > { %v477_v19 = vpack.c.bf16 %v450_v18, %v450_v18 }
  0xe3   : > { %v499_v21 = vunpack.c.l.bf16 %v477_v19 }
  0xe5   : > { %v516_v22 = vadd.f32 %v1500_v37, %v499_v21 }
  0xe7   : > { %v564_v24 = vmax.f32 %v516_v22, 0.0 }
  0xe8   : > { %v453_v25 = vpop.f32.mrf.mxu0 }
  0xe9   : > { %v575_v26 = vpack.c.bf16 %v564_v24, %v563_v23  ;;  %v478_v27 = vpack.c.bf16 %v453_v25, %v453_v25 }
  0xeb   : > { %1198 = vmatmul.msk.bf16.gmra.mxu1 %vm611_vm1, %v575_v26  ;;  %v500_v28 = vunpack.c.l.bf16 %v478_v27 }
  0xed   : > { %v517_v31 = vadd.f32 %v1500_v37, %v500_v28 }
  0xef   : > { %v565_v34 = vmax.f32 %v517_v31, 0.0 }
  0xf0   : > { %v455_v29 = vpop.f32.mrf.mxu0 }
  0xf1   : > { %v479_v30 = vpack.c.bf16 %v455_v29, %v455_v29 }
  0xf3   : > { %v501_v32 = vunpack.c.l.bf16 %v479_v30 }
  0xf5   : > { %v518_v33 = vadd.f32 %v1500_v37, %v501_v32 }
  0xf7   : > { %v566_v35 = vmax.f32 %v518_v33, 0.0 }
  0xf8   : > { %v458_v36 = vpop.f32.mrf.mxu0 }
  0xf9   : > { %v576_v38 = vpack.c.bf16 %v566_v35, %v565_v34  ;;  %v480_v39 = vpack.c.bf16 %v458_v36, %v458_v36 }
  0xfb   : > { %1199 = vmatmul.msk.bf16.gmra.mxu1 %vm611_vm1, %v576_v38  ;;  %v502_v40 = vunpack.c.l.bf16 %v480_v39 }
  0xfd   : > { %v519_v43 = vadd.f32 %v1500_v37, %v502_v40 }
  0xff   : > { %v567_v46 = vmax.f32 %v519_v43, 0.0 }
 0x100   : > { %v460_v41 = vpop.f32.mrf.mxu0 }
 0x101   : > { %v481_v42 = vpack.c.bf16 %v460_v41, %v460_v41 }
 0x103   : > { %v503_v44 = vunpack.c.l.bf16 %v481_v42 }
 0x105   : > { %v520_v45 = vadd.f32 %v1500_v37, %v503_v44 }
 0x107   : > { %v568_v47 = vmax.f32 %v520_v45, 0.0 }
 0x108   : > { %v463_v48 = vpop.f32.mrf.mxu0 }
 0x109   : > { %v577_v49 = vpack.c.bf16 %v568_v47, %v567_v46  ;;  %v482_v51 = vpack.c.bf16 %v463_v48, %v463_v48 }
 0x10b   : > { %1200 = vmatmul.msk.bf16.gmra.mxu1 %vm611_vm1, %v577_v49  ;;  %v504_v53 = vunpack.c.l.bf16 %v482_v51 }
 0x10d   : > { %v521_v57 = vadd.f32 %v1500_v37, %v504_v53 }
 0x10f   : > { %v569_v61 = vmax.f32 %v521_v57, 0.0 }
 0x110   : > { %v465_v54 = vpop.f32.mrf.mxu0 }
 0x111   : > { %v483_v55 = vpack.c.bf16 %v465_v54, %v465_v54 }
 0x113   : > { %v505_v58 = vunpack.c.l.bf16 %v483_v55 }
 0x115   : > { %v522_v59 = vadd.f32 %v1500_v37, %v505_v58 }
 0x117   : > { %v570_v62 = vmax.f32 %v522_v59, 0.0 }
 0x119   : > { %v578_v63 = vpack.c.bf16 %v570_v62, %v569_v61 }
 0x11b   : > { %1201 = vmatmul.msk.bf16.gmra.mxu1 %vm611_vm1, %v578_v63 }
 0x128   : > { %v645_v3 = vpop.f32.mrf.mxu1 }
 0x129   : > { %v685_v4 = vpack.c.bf16 %v645_v3, %v645_v3 }
 0x12b   : > { %v707_v37 = vunpack.c.l.bf16 %v685_v4 }
 0x12d   : > { %v724_v9 = vadd.f32 %v1541_v6, %v707_v37 }
 0x12f   : > { %v772_v12 = vmax.f32 %v724_v9, 0.0 }
 0x130   : > { %v647_v7 = vpop.f32.mrf.mxu1 }
 0x131   : > { %v686_v8 = vpack.c.bf16 %v647_v7, %v647_v7 }
 0x133   : > { %v708_v10 = vunpack.c.l.bf16 %v686_v8 }
 0x135   : > { %v725_v11 = vadd.f32 %v1541_v6, %v708_v10 }
 0x137   : > { %v773_v13 = vmax.f32 %v725_v11, 0.0 }
 0x138   : > { %v650_v14 = vpop.f32.mrf.mxu1 }
 0x139   : > { %v788_v15 = vpack.c.bf16 %v773_v13, %v772_v12  ;;  %v687_v16 = vpack.c.bf16 %v650_v14, %v650_v14 }
 0x13b   : > { %1218 = vmatmul.msk.bf16.vlgmr.msra.gmra.mxu2 %vm611_vm1, %v788_v15  ;;  %v709_v17 = vunpack.c.l.bf16 %v687_v16 }
 0x13d   : > { %v726_v20 = vadd.f32 %v1541_v6, %v709_v17 }
 0x13f   : > { %v774_v23 = vmax.f32 %v726_v20, 0.0 }
 0x140   : > { %v652_v18 = vpop.f32.mrf.mxu1 }
 0x141   : > { %v688_v19 = vpack.c.bf16 %v652_v18, %v652_v18 }
 0x143   : > { %v710_v21 = vunpack.c.l.bf16 %v688_v19 }
 0x145   : > { %v727_v22 = vadd.f32 %v1541_v6, %v710_v21 }
 0x147   : > { %v775_v24 = vmax.f32 %v727_v22, 0.0 }
 0x148   : > { %v655_v25 = vpop.f32.mrf.mxu1 }
 0x149   : > { %v789_v26 = vpack.c.bf16 %v775_v24, %v774_v23  ;;  %v689_v27 = vpack.c.bf16 %v655_v25, %v655_v25 }
 0x14b   : > { %1219 = vmatmul.msk.bf16.gmra.mxu2 %vm611_vm1, %v789_v26  ;;  %v711_v28 = vunpack.c.l.bf16 %v689_v27 }
 0x14d   : > { %v728_v31 = vadd.f32 %v1541_v6, %v711_v28 }
 0x14f   : > { %v776_v34 = vmax.f32 %v728_v31, 0.0 }
 0x150   : > { %v657_v29 = vpop.f32.mrf.mxu1 }
 0x151   : > { %v690_v30 = vpack.c.bf16 %v657_v29, %v657_v29  ;;  %v917_v29 = vld [vmem:[%s1650_s6] sm:$0x1] }
 0x153   : > { %v712_v32 = vunpack.c.l.bf16 %v690_v30  ;;  %v918_v30 = vpack.c.bf16 %v917_v29, %v917_v29 }
 0x155   : > { %v729_v33 = vadd.f32 %v1541_v6, %v712_v32  ;;  %v920_v31 = vpack.i.b16 %v918_v30, %v918_v30 }
 0x157   : > { %v777_v35 = vmax.f32 %v729_v33, 0.0 }
 0x158   : > { %v660_v36 = vpop.f32.mrf.mxu1 }
 0x159   : > { %v790_v38 = vpack.c.bf16 %v777_v35, %v776_v34  ;;  %v691_v39 = vpack.c.bf16 %v660_v36, %v660_v36  ;;  %v922_v34 = vperm.slane %v920_v31, 0 }
 0x15b   : > { %1220 = vmatmul.msk.bf16.gmra.mxu2 %vm611_vm1, %v790_v38  ;;  %v713_v40 = vunpack.c.l.bf16 %v691_v39  ;;  %v1570_v36 = vunpack.c.l.bf16 %v922_v34 }
 0x15d   : > { %v730_v43 = vadd.f32 %v1541_v6, %v713_v40 }
 0x15f   : > { %v778_v46 = vmax.f32 %v730_v43, 0.0 }
 0x160   : > { %v662_v41 = vpop.f32.mrf.mxu1 }
 0x161   : > { %v692_v42 = vpack.c.bf16 %v662_v41, %v662_v41 }
 0x163   : > { %v714_v44 = vunpack.c.l.bf16 %v692_v42 }
 0x165   : > { %v731_v45 = vadd.f32 %v1541_v6, %v714_v44 }
 0x167   : > { %v779_v47 = vmax.f32 %v731_v45, 0.0 }
 0x168   : > { %v665_v48 = vpop.f32.mrf.mxu1 }
 0x169   : > { %v791_v49 = vpack.c.bf16 %v779_v47, %v778_v46  ;;  %v693_v50 = vpack.c.bf16 %v665_v48, %v665_v48 }
 0x16b   : > { %1221 = vmatmul.msk.bf16.gmra.mxu2 %vm611_vm1, %v791_v49  ;;  %v715_v51 = vunpack.c.l.bf16 %v693_v50 }
 0x16d   : > { %v732_v54 = vadd.f32 %v1541_v6, %v715_v51 }
 0x16f   : > { %v780_v57 = vmax.f32 %v732_v54, 0.0 }
 0x170   : > { %v667_v52 = vpop.f32.mrf.mxu1 }
 0x171   : > { %v694_v53 = vpack.c.bf16 %v667_v52, %v667_v52 }
 0x173   : > { %v716_v55 = vunpack.c.l.bf16 %v694_v53 }
 0x175   : > { %v733_v56 = vadd.f32 %v1541_v6, %v716_v55 }
 0x177   : > { %v781_v58 = vmax.f32 %v733_v56, 0.0 }
 0x178   : > { %v670_v59 = vpop.f32.mrf.mxu1 }
 0x179   : > { %v792_v60 = vpack.c.bf16 %v781_v58, %v780_v57  ;;  %v695_v61 = vpack.c.bf16 %v670_v59, %v670_v59 }
 0x17b   : > { %1222 = vmatmul.msk.bf16.gmra.mxu2 %vm611_vm1, %v792_v60  ;;  %v717_v62 = vunpack.c.l.bf16 %v695_v61 }
 0x17d   : > { %v734_v1 = vadd.f32 %v1541_v6, %v717_v62 }
 0x17f   : > { %v782_v4 = vmax.f32 %v734_v1, 0.0 }
 0x180   : > { %v672_v63 = vpop.f32.mrf.mxu1 }
 0x181   : > { %v696_v0 = vpack.c.bf16 %v672_v63, %v672_v63 }
 0x183   : > { %v718_v2 = vunpack.c.l.bf16 %v696_v0 }
 0x185   : > { %v735_v3 = vadd.f32 %v1541_v6, %v718_v2 }
 0x187   : > { %v783_v5 = vmax.f32 %v735_v3, 0.0 }
 0x188   : > { %v675_v37 = vpop.f32.mrf.mxu1 }
 0x189   : > { %v793_v7 = vpack.c.bf16 %v783_v5, %v782_v4  ;;  %v697_v8 = vpack.c.bf16 %v675_v37, %v675_v37 }
 0x18b   : > { %1223 = vmatmul.msk.bf16.gmra.mxu2 %vm611_vm1, %v793_v7  ;;  %v719_v9 = vunpack.c.l.bf16 %v697_v8 }
 0x18d   : > { %v736_v12 = vadd.f32 %v1541_v6, %v719_v9 }
 0x18f   : > { %v784_v15 = vmax.f32 %v736_v12, 0.0 }
 0x190   : > { %v677_v10 = vpop.f32.mrf.mxu1 }
 0x191   : > { %v698_v11 = vpack.c.bf16 %v677_v10, %v677_v10 }
 0x193   : > { %v720_v13 = vunpack.c.l.bf16 %v698_v11 }
 0x195   : > { %v737_v14 = vadd.f32 %v1541_v6, %v720_v13 }
 0x197   : > { %v785_v16 = vmax.f32 %v737_v14, 0.0 }
 0x198   : > { %v680_v17 = vpop.f32.mrf.mxu1 }
 0x199   : > { %v794_v18 = vpack.c.bf16 %v785_v16, %v784_v15  ;;  %v699_v19 = vpack.c.bf16 %v680_v17, %v680_v17 }
 0x19b   : > { %1224 = vmatmul.msk.bf16.gmra.mxu2 %vm611_vm1, %v794_v18  ;;  %v721_v20 = vunpack.c.l.bf16 %v699_v19 }
 0x19d   : > { %v738_v23 = vadd.f32 %v1541_v6, %v721_v20 }
 0x19f   : > { %v786_v26 = vmax.f32 %v738_v23, 0.0 }
 0x1a0   : > { %v682_v21 = vpop.f32.mrf.mxu1 }
 0x1a1   : > { %v700_v22 = vpack.c.bf16 %v682_v21, %v682_v21 }
 0x1a3   : > { %v722_v24 = vunpack.c.l.bf16 %v700_v22 }
 0x1a5   : > { %v739_v25 = vadd.f32 %v1541_v6, %v722_v24 }
 0x1a7   : > { %v787_v27 = vmax.f32 %v739_v25, 0.0 }
 0x1a9   : > { %v795_v28 = vpack.c.bf16 %v787_v27, %v786_v26 }
 0x1ab   : > { %1225 = vmatmul.msk.bf16.gmra.mxu2 %vm611_vm1, %v795_v28 }
 0x1be   : > { %v861_v32 = vpop.f32.mrf.mxu2 }
 0x1bf   : > { %v901_v33 = vpack.c.bf16 %v861_v32, %v861_v32 }
 0x1c1   : > { %v923_v35 = vunpack.c.l.bf16 %v901_v33 }
 0x1c3   : > { %v940_v6 = vadd.f32 %v1570_v36, %v923_v35 }
 0x1c5   : > { %v988_v42 = vmax.f32 %v940_v6, 0.0 }
 0x1c6   : > { %v863_v38 = vpop.f32.mrf.mxu2 }
 0x1c7   : > { %v902_v39 = vpack.c.bf16 %v863_v38, %v863_v38 }
 0x1c9   : > { %v924_v40 = vunpack.c.l.bf16 %v902_v39 }
 0x1cb   : > { %v941_v41 = vadd.f32 %v1570_v36, %v924_v40 }
 0x1cd   : > { %v989_v43 = vmax.f32 %v941_v41, 0.0 }
 0x1ce   : > { %v866_v44 = vpop.f32.mrf.mxu2 }
 0x1cf   : > { %v1574_v45 = vpack.c.bf16 %v989_v43, %v988_v42  ;;  %v903_v46 = vpack.c.bf16 %v866_v44, %v866_v44 }
 0x1d1   : > { %v925_v47 = vunpack.c.l.bf16 %v903_v46 }
 0x1d3   : > { %v942_v50 = vadd.f32 %v1570_v36, %v925_v47 }
 0x1d5   : > { %v990_v53 = vmax.f32 %v942_v50, 0.0 }
 0x1d6   : > { %v868_v48 = vpop.f32.mrf.mxu2 }
 0x1d7   : > { %v904_v49 = vpack.c.bf16 %v868_v48, %v868_v48 }
 0x1d9   : > { %v926_v51 = vunpack.c.l.bf16 %v904_v49 }
 0x1db   : > { %v943_v52 = vadd.f32 %v1570_v36, %v926_v51 }
 0x1dd   : > { %v991_v54 = vmax.f32 %v943_v52, 0.0 }
 0x1de   : > { %v871_v55 = vpop.f32.mrf.mxu2 }
 0x1df   : > { %v1578_v56 = vpack.c.bf16 %v991_v54, %v990_v53  ;;  %v905_v57 = vpack.c.bf16 %v871_v55, %v871_v55 }
 0x1e1   : > { %v927_v58 = vunpack.c.l.bf16 %v905_v57 }
 0x1e3   : > { %v944_v61 = vadd.f32 %v1570_v36, %v927_v58 }
 0x1e5   : > { %v992_v0 = vmax.f32 %v944_v61, 0.0 }
 0x1e6   : > { %v873_v59 = vpop.f32.mrf.mxu2 }
 0x1e7   : > { %v906_v60 = vpack.c.bf16 %v873_v59, %v873_v59 }
 0x1e9   : > { %v928_v62 = vunpack.c.l.bf16 %v906_v60 }
 0x1eb   : > { %v945_v63 = vadd.f32 %v1570_v36, %v928_v62 }
 0x1ed   : > { %v993_v1 = vmax.f32 %v945_v63, 0.0 }
 0x1ee   : > { %v876_v2 = vpop.f32.mrf.mxu2 }
 0x1ef   : > { %v1582_v3 = vpack.c.bf16 %v993_v1, %v992_v0  ;;  %v907_v4 = vpack.c.bf16 %v876_v2, %v876_v2  ;;  %v1013_v2 = vld [vmem:[%s1652_s8] sm:$0xff] }
 0x1f1   : > { %v929_v5 = vunpack.c.l.bf16 %v907_v4  ;;  %v1029_v4 = vsel %vm611_vm1, %v1582_v3, 0 }
 0x1f3   : > { %v946_v8 = vadd.f32 %v1570_v36, %v929_v5  ;;  %v1026_v5 = vsel %vm611_vm1, %v1578_v56, 0 }
 0x1f5   : > { %v994_v11 = vmax.f32 %v946_v8, 0.0 }
 0x1f6   : > { %v878_v37 = vpop.f32.mrf.mxu2 }
 0x1f7   : > { %v908_v7 = vpack.c.bf16 %v878_v37, %v878_v37  ;;  %v1023_v37 = vsel %vm611_vm1, %v1574_v45, 0 }
 0x1f9   : > { %v930_v9 = vunpack.c.l.bf16 %v908_v7  ;;  %v1012_v7 = vld [vmem:[%s1651_s7] sm:$0xf] }
 0x1fb   : > { %v947_v10 = vadd.f32 %v1570_v36, %v930_v9 }
 0x1fd   : > { %v995_v12 = vmax.f32 %v947_v10, 0.0 }
 0x1fe   : > { %v881_v13 = vpop.f32.mrf.mxu2 }
 0x1ff   : > { %v1007_v14 = vpack.c.bf16 %v995_v12, %v994_v11  ;;  %v909_v15 = vpack.c.bf16 %v881_v13, %v881_v13 }
 0x201   : > { %v931_v16 = vunpack.c.l.bf16 %v909_v15  ;;  %v1032_v1 = vsel %vm611_vm1, %v1007_v14, 0 }
 0x203   : > { %v948_v19 = vadd.f32 %v1570_v36, %v931_v16 }
 0x205   : > { %v996_v22 = vmax.f32 %v948_v19, 0.0 }
 0x206   : > { %v883_v17 = vpop.f32.mrf.mxu2 }
 0x207   : > { %v910_v18 = vpack.c.bf16 %v883_v17, %v883_v17 }
 0x209   : > { %v932_v20 = vunpack.c.l.bf16 %v910_v18 }
 0x20b   : > { %v949_v21 = vadd.f32 %v1570_v36, %v932_v20 }
 0x20d   : > { %v997_v23 = vmax.f32 %v949_v21, 0.0 }
 0x20e   : > { %v886_v24 = vpop.f32.mrf.mxu2 }
 0x20f   : > { %v1008_v25 = vpack.c.bf16 %v997_v23, %v996_v22  ;;  %v911_v47 = vpack.c.bf16 %v886_v24, %v886_v24 }
 0x211   : > { %v933_v53 = vunpack.c.l.bf16 %v911_v47  ;;  %v1035_v0 = vsel %vm611_vm1, %v1008_v25, 0 }
 0x213   : > { %v950_v58 = vadd.f32 %v1570_v36, %v933_v53 }
 0x215   : > { %v998_v61 = vmax.f32 %v950_v58, 0.0 }
 0x216   : > { %v888_v26 = vpop.f32.mrf.mxu2 }
 0x217   : > { %v912_v42 = vpack.c.bf16 %v888_v26, %v888_v26 }
 0x219   : > { %v934_v50 = vunpack.c.l.bf16 %v912_v42 }
 0x21b   : > { %v951_v55 = vadd.f32 %v1570_v36, %v934_v50 }
 0x21d   : > { %v999_v59 = vmax.f32 %v951_v55, 0.0 }
 0x21e   : > { %v891_v27 = vpop.f32.mrf.mxu2 }
 0x21f   : > { %v913_v34 = vpack.c.bf16 %v891_v27, %v891_v27  ;;  %v1009_v62 = vpack.c.bf16 %v999_v59, %v998_v61 }
 0x221   : > { %v935_v40 = vunpack.c.l.bf16 %v913_v34  ;;  %v1038_v63 = vsel %vm611_vm1, %v1009_v62, 0 }
 0x223   : > { %v952_v48 = vadd.f32 %v1570_v36, %v935_v40 }
 0x225   : > { %v1000_v54 = vmax.f32 %v952_v48, 0.0 }
 0x226   : > { %v893_v28 = vpop.f32.mrf.mxu2 }
 0x227   : > { %v914_v31 = vpack.c.bf16 %v893_v28, %v893_v28 }
 0x229   : > { %v936_v38 = vunpack.c.l.bf16 %v914_v31 }
 0x22b   : > { %v953_v43 = vadd.f32 %v1570_v36, %v936_v38 }
 0x22d   : > { %v1001_v51 = vmax.f32 %v953_v43, 0.0 }
 0x22e   : > { %v896_v29 = vpop.f32.mrf.mxu2 }
 0x22f   : > { %v915_v30 = vpack.c.bf16 %v896_v29, %v896_v29  ;;  %v1010_v57 = vpack.c.bf16 %v1001_v51, %v1000_v54 }
 0x231   : > { %v937_v32 = vunpack.c.l.bf16 %v915_v30  ;;  %v1041_v60 = vsel %vm611_vm1, %v1010_v57, 0 }
 0x233   : > { %v954_v39 = vadd.f32 %v1570_v36, %v937_v32 }
 0x235   : > { %v1002_v44 = vmax.f32 %v954_v39, 0.0 }
 0x236   : > { %v898_v33 = vpop.f32.mrf.mxu2 }
 0x237   : > { %v916_v35 = vpack.c.bf16 %v898_v33, %v898_v33 }
 0x239   : > { %v938_v6 = vunpack.c.l.bf16 %v916_v35 }
 0x23b   : > { %v955_v41 = vadd.f32 %v1570_v36, %v938_v6  ;;  %v1350_v36 = vmov 0  }
 0x23c   : > { %1281 = vset.pattern.permute.xlu0 %v1350_v36 }
 0x23d   : > { %v1003_v46 = vmax.f32 %v955_v41, 0.0  ;;  %1016 = vperm.xlu0 %1281, %v1013_v2  }
 0x23f   : > { %v1011_v49 = vpack.c.bf16 %v1003_v46, %v1002_v44 }
 0x241   : > { %v1044_v52 = vsel %vm611_vm1, %v1011_v49, 0 }
 0x242   : > { %1046 = vmatpush.bf16.xpose.msra.mxu3 %v1044_v52 }
 0x24a   : > { %1047 = vmatpush.bf16.xpose.msra.mxu3 %v1041_v60 }
 0x252   : > { %1048 = vmatpush.bf16.xpose.msra.mxu3 %v1038_v63 }
 0x25a   : > { %1049 = vmatpush.bf16.xpose.msra.mxu3 %v1035_v0 }
 0x262   : > { %1050 = vmatpush.bf16.xpose.msra.mxu3 %v1032_v1 }
 0x26a   : > { %1051 = vmatpush.bf16.xpose.msra.mxu3 %v1029_v4 }
 0x272   : > { %1052 = vmatpush.bf16.xpose.msra.mxu3 %v1026_v5 }
 0x27a   : > { %1053 = vmatpush.bf16.xpose.msra.mxu3 %v1023_v37 }
 0x281   : > { %1226 = vmatmul.msk.bf16.vlgmr.msra.gmra.mxu3 %vm611_vm1, %v1012_v7 }
 0x2af   : > { %v1017_v8 = vpop.permute.xlu0 %1016 }
 0x304   : > { %v1055_v9 = vpop.f32.mrf.mxu3 }
 0x305   : > { %v1056_v10 = vadd.f32 %v1055_v9, %v1017_v8 }
 0x307   : > { %v1059_v11 = vrot.slane %v1056_v10, 4 }
 0x309   : > { %v1060_v3 = vmax.f32 %v1056_v10, %v1059_v11 }
 0x30b   : > { %v1061_v12 = vrot.slane %v1060_v3, 2 }
 0x30c   : > { %v1057_v13 = vpop.f32.mrf.mxu3 }
 0x30d   : > { %v1062_v56 = vmax.f32 %v1060_v3, %v1061_v12 }
 0x30f   : > { %v1063_v14 = vrot.slane %v1062_v56, 1 }
 0x311   : > { %v1064_v15 = vmax.f32 %v1062_v56, %v1063_v14 }
 0x313   : > { %v1065_v45 = vsub.f32 %v1056_v10, %v1064_v15 }
 0x315   : > { %v1066_v16 = vmul.f32 1.442695, %v1065_v45 }
 0x317   : > { %1282 = vpow2.f32 %v1066_v16 }
 0x31d   : > { %v1283_v17 = vpop.eup %1282 }
 0x31e   : > { %v1068_v18 = vrot.slane %v1283_v17, 4 }
 0x320   : > { %v1069_v19 = vadd.f32 %v1283_v17, %v1068_v18 }
 0x322   : > { %v1070_v20 = vrot.slane %v1069_v19, 2 }
 0x324   : > { %v1071_v21 = vadd.f32 %v1070_v20, %v1069_v19 }
 0x326   : > { %v1072_v22 = vrot.slane %v1071_v21, 1 }
 0x328   : > { %v1073_v23 = vadd.f32 %v1072_v22, %v1071_v21 }
 0x32a   : > { %1284 = vrcp.f32 %v1073_v23 }
 0x330   : > { %v1285_v24 = vpop.eup %1284 }
 0x331   : > { %v1075_v25 = vmul.f32 %v1285_v24, %v1073_v23 }
 0x333   : > { %v1076_v26 = vsub.f32 2.0, %v1075_v25 }
 0x335   : > { %v1077_v27 = vmul.f32 %v1285_v24, %v1076_v26 }
 0x337   : > { %v1078_v28 = vmul.f32 %v1283_v17, %v1077_v27 }
 0x339   : > { %1079 = vst [vmem:[%s338_s26] sm:$0xff] %v1078_v28 }
 0x33a   : > { %1313 = shalt.err (!%p1310_p3)
}
 0x33b   : > { %1241 = dma.vmem_to_hbm [thread:$0]  (%p1439_p5), %s1094_s27, 128, %s1096_s28, %s1081_s29  }
 0x33c PF: > { %p1247_p4 = scmp.ge.s32.totalorder %s1348_s12, 2  ;;  %s1107_s17 = sand.u32 1, %s1336_s30  }
 0x33d   : > { %s1108_s25 = scalar_lea.sflag [#allocation3], %s1107_s17 }
 0x33e   : > { %p1244_p7 = pnand %p1247_p4, %p1443_p6 }
 0x340   : > { %p1245_p8 = pneg %p1244_p7 }
 0x342   : > { %1331 = dma.done.wait (%p1245_p8), %s1108_s25, 128  }
 0x343   : > { %1333 = vsyncadd (%p1245_p8), %s1108_s25, 4294967168  ;;  %p19_p9 = scmp.ge.s32.totalorder %s1426_s15, 4   ;;  %s1656_s30 = smov %s1340_s10 }
 0x344   : > { %s1657_s10 = smov %s1344_s11  ;;  %s1658_s11 = smov %s1437_s18 }
 0x345   : > { %s1659_s12 = smov %s1426_s15  ;;  %21 = sbr.rel (!%p19_p9) target bundleno = 3 (0x3), region = 91 }
 0x34a   :  { %1114 = vsyncpa [#allocation3], 1 }
 0x34b   :  { %1116 = vsyncpa [#allocation3 + $0x1], 1 }

</bundles_post_ra>
